<compile_context>
chip_gen: v7x
topology: tpu7x:2x2x1
jax: 0.10.0
libtpu: 0.0.40
codegen_flags: <defaults>
</compile_context>

<pallas_src>
import functools
import math

import jax
import jax.numpy as jnp
from jax import lax
from jax.experimental import pallas as pl
from jax.experimental.pallas import tpu as pltpu

_MIB = 1024 * 1024


def _mha_kernel(k_ref, q_ref, v_ref, out_ref, w_ref, *, scale, group, m):
    # k_ref: (G, dh, n), q_ref: (G, dh, m), v_ref: (G, doh, n)
    # out_ref: (1, doh, G*m), w_ref: (1, n, G*m)   -- heads folded into lanes
    k = k_ref[...]
    q = q_ref[...] * scale          # fold 1/sqrt(d) into the small q tile (dh*m, not n*m)
    v = v_ref[...]

    # affinity[g] = k[g]^T @ q[g] -> (G, n, m); contraction over dh expressed directly
    # (transposed-LHS form consumed natively by the MXU, no XLU transpose of k).
    aff = lax.dot_general(
        k, q,
        dimension_numbers=(((1,), (1,)), ((0,), (0,))),
        preferred_element_type=jnp.float32,
    )

    # softmax over the key/sequence axis (torch dim=1 of the (bh, n, m) affinity)
    aff = aff - jnp.max(aff, axis=1, keepdims=True)
    e = jnp.exp(aff)
    denom = jnp.sum(e, axis=1, keepdims=True)      # (G, 1, m)
    r = pl.reciprocal(denom, approx=True)           # EUP slot; VPU stays free
    r = r * (2.0 - denom * r)                       # one Newton step -> ~fp32 accuracy
    w = e * r                                       # (G, n, m) f32

    # output[g] = v[g] @ w[g] -> (G, doh, m)
    # NOTE: with bf16 inputs the weights are down-cast to bf16 for this matmul and the
    # returned weight tensor (small precision delta vs an all-f32 reference).
    out = lax.dot_general(
        v, w.astype(v.dtype),
        dimension_numbers=(((2,), (1,)), ((0,), (0,))),
        preferred_element_type=jnp.float32,
    )

    n = w.shape[1]
    doh = out.shape[1]
    # Lane-dense writeback: ONE relayout + ONE full-width (G*m lanes) unmasked store
    # per output, instead of 2*G masked per-head slice stores (each of which would
    # cost an XLU lane-rotate + vst.msk).
    w_ref[0] = jnp.swapaxes(w, 0, 1).reshape(n, group * m).astype(w_ref.dtype)
    out_ref[0] = jnp.swapaxes(out, 0, 1).reshape(doh, group * m).astype(out_ref.dtype)


def _vmem_budget_bytes():
    """Per-generation step budget + scoped-VMEM limit, derived from physical VMEM."""
    try:
        phys = int(pltpu.get_tpu_info().vmem_capacity_bytes)
    except Exception:
        phys = 64 * _MIB  # conservative fallback (v7x floor)
    # Leave room for compiler internal scratch and spill slack:
    #   v7x  (64 MiB physical)  -> 24 MiB step budget, 32 MiB scoped limit
    #   v5e/v6e (128 MiB)       -> 56 MiB step budget, 64 MiB scoped limit
    budget = max(16 * _MIB, phys // 2 - 8 * _MIB)
    limit = min(phys, budget + 8 * _MIB)
    return budget, limit


def _pick_group(bh, dh, doh, n, m, itemsize, vmem_budget, min_steps=2):
    """Heads processed per grid step.

    Prefer the LARGEST divisor of bh whose folded output width G*m is a multiple of
    128 (lane-dense stores + dense HBM DMA) and whose per-step footprint fits the
    budget, while keeping at least `min_steps` grid steps when possible so the
    BlockSpec pipeline has something to overlap.  Fall back to >=128-lane-wide, then
    to the largest fitting divisor (non-lane-dense fallbacks are correct but lose the
    dense-store invariant).
    """
    divisors = [g for g in range(1, bh + 1) if bh % g == 0]

    def step_bytes(g):
        # double-buffered DMA blocks (inputs + outputs)
        dma = 2 * g * (dh * n + dh * m + doh * n + doh * m + n * m) * itemsize
        # f32 in-kernel intermediates (aff / e / w) + relayout temporaries, single
        # buffered -- these matter on v7x's 64 MiB VMEM for longer n.
        interm = 3 * g * n * m * 4 + g * (n * m + doh * m) * 4
        return dma + interm

    fits = [g for g in divisors if step_bytes(g) <= vmem_budget] or [1]

    def pick(cands):
        piped = [g for g in cands if bh // g >= min_steps]
        return max(piped) if piped else max(cands)

    lane_dense = [g for g in fits if (g * m) % 128 == 0]
    if lane_dense:
        return pick(lane_dense)
    wide = [g for g in fits if g * m >= 128]
    if wide:
        return pick(wide)
    return max(fits)


def multihead_attention(key, query, value, num_heads=4):
    """Matches MultiheadAttention.forward(key, query, value) -> (output, weight)."""
    b, d, n = key.shape
    _, _, m = query.shape
    _, do, nv = value.shape
    H = num_heads
    assert d % H == 0 and do % H == 0, "channel dims must be divisible by num_heads"
    assert nv == n, "value's last dim must equal key's last dim (torch.bmm constraint)"
    dh, doh = d // H, do // H
    bh = b * H

    k = key.reshape(bh, dh, n)
    q = query.reshape(bh, dh, m)
    v = value.reshape(bh, doh, n)

    vmem_budget, vmem_limit = _vmem_budget_bytes()
    G = _pick_group(bh, dh, doh, n, m, jnp.dtype(key.dtype).itemsize, vmem_budget)
    nsteps = bh // G
    # TODO(synk): flash-style n-tiling (running max/sum over an 'arbitrary' n axis) +
    # an m 'parallel' axis so long sequences stay in v7x's 64 MiB VMEM instead of only
    # shrinking G.
    # TODO(synk): input-side lane density (fold heads into the trailing dim of k/q/v or
    # round n/m up to 128); current input DMAs are only n/m lanes wide.
    # TODO(synk): on v7x, pick G so nsteps % 2 == 0 and shard the head axis across the
    # two TensorCores (CORE_PARALLEL / core_map); plain 'parallel' is kept here.

    kernel = functools.partial(_mha_kernel, scale=1.0 / math.sqrt(d), group=G, m=m)

    out_folded, w_folded = pl.pallas_call(
        kernel,
        out_shape=(
            jax.ShapeDtypeStruct((nsteps, doh, G * m), key.dtype),
            jax.ShapeDtypeStruct((nsteps, n, G * m), key.dtype),
        ),
        grid=(nsteps,),
        in_specs=[
            pl.BlockSpec((G, dh, n), lambda i: (i, 0, 0)),
            pl.BlockSpec((G, dh, m), lambda i: (i, 0, 0)),
            pl.BlockSpec((G, doh, n), lambda i: (i, 0, 0)),
        ],
        out_specs=(
            pl.BlockSpec((1, doh, G * m), lambda i: (i, 0, 0)),
            pl.BlockSpec((1, n, G * m), lambda i: (i, 0, 0)),
        ),
        compiler_params=pltpu.CompilerParams(
            dimension_semantics=("parallel",),
            vmem_limit_bytes=int(vmem_limit),
        ),
    )(k, q, v)

    # Un-fold the head axis back out of the lane dimension (wrapper-side layout
    # plumbing only; XLA fuses these).
    output = (out_folded.reshape(nsteps, doh, G, m)
              .transpose(0, 2, 1, 3)
              .reshape(b, do, m))
    weight = (w_folded.reshape(nsteps, n, G, m)
              .transpose(0, 2, 1, 3)
              .reshape(b, H, n, m))
    return output, weight


def _reference(key, query, value, num_heads=4):
    b, d, n = key.shape
    _, _, m = query.shape
    _, do, _ = value.shape
    H = num_heads
    k = key.reshape(b * H, d // H, n)
    q = query.reshape(b * H, d // H, m)
    v = value.reshape(b * H, do // H, n)
    aff = jnp.einsum("bdn,bdm->bnm", k, q) / math.sqrt(d)
    w = jax.nn.softmax(aff, axis=1)
    out = jnp.einsum("bdn,bnm->bdm", v, w)
    return out.reshape(b, -1, m), w.reshape(b, H, n, m)


if __name__ == "__main__":
    # small shapes: batch=2, heads=4, d=32, do=32, seq n=16, seq m=16
    B, H, D, Do, N, M = 2, 4, 32, 32, 16, 16
    rng = jax.random.PRNGKey(0)
    kk, kq, kv = jax.random.split(rng, 3)
    key = jax.random.normal(kk, (B, D, N), dtype=jnp.float32)
    query = jax.random.normal(kq, (B, D, M), dtype=jnp.float32)
    value = jax.random.normal(kv, (B, Do, N), dtype=jnp.float32)

    out, weight = multihead_attention(key, query, value, num_heads=H)
    jax.block_until_ready((out, weight))

    out_ref, w_ref = _reference(key, query, value, num_heads=H)
    assert out.shape == (B, Do, M) and weight.shape == (B, H, N, M)
    # Newton-refined EUP reciprocal keeps weights well inside 1e-4 of the exact ref.
    assert jnp.allclose(out, out_ref, atol=1e-4, rtol=1e-4)
    assert jnp.allclose(weight, w_ref, atol=1e-4, rtol=1e-4)

    print("KERNEL_OK")
</pallas_src>

<mosaic_0001>
module attributes {stable_mosaic.version = 11 : i64} {
  func.func @_mha_kernel(%arg0: i32, %arg1: memref<8x8x16xf32, #tpu.memory_space<vmem>>, %arg2: memref<8x8x16xf32, #tpu.memory_space<vmem>>, %arg3: memref<8x8x16xf32, #tpu.memory_space<vmem>>, %arg4: memref<1x8x128xf32, #tpu.memory_space<vmem>>, %arg5: memref<1x16x128xf32, #tpu.memory_space<vmem>>) attributes {dimension_semantics = [#tpu.dimension_semantics<parallel>], iteration_bounds = array<i64: 1>, scalar_prefetch = 0 : i64, scratch_operands = 0 : i64, tpu.core_type = #tpu.core_type<tc>, window_params = [{transform_indices = @transform_0, window_bounds = array<i64: 8, 8, 16>}, {transform_indices = @transform_1, window_bounds = array<i64: 8, 8, 16>}, {transform_indices = @transform_2, window_bounds = array<i64: 8, 8, 16>}, {transform_indices = @transform_3, window_bounds = array<i64: 1, 8, 128>}, {transform_indices = @transform_4, window_bounds = array<i64: 1, 16, 128>}]} {
    %c0 = arith.constant 0 : index
    %c0_0 = arith.constant 0 : index
    %c0_1 = arith.constant 0 : index
    %0 = vector.load %arg1[%c0, %c0_0, %c0_1] : memref<8x8x16xf32, #tpu.memory_space<vmem>>, vector<8x8x16xf32>
    %c0_2 = arith.constant 0 : index
    %c0_3 = arith.constant 0 : index
    %c0_4 = arith.constant 0 : index
    %1 = vector.load %arg2[%c0_2, %c0_3, %c0_4] : memref<8x8x16xf32, #tpu.memory_space<vmem>>, vector<8x8x16xf32>
    %cst = arith.constant 0.176776692 : f32
    %2 = vector.broadcast %cst : f32 to vector<8x8x16xf32>
    %3 = arith.mulf %1, %2 : vector<8x8x16xf32>
    %c0_5 = arith.constant 0 : index
    %c0_6 = arith.constant 0 : index
    %c0_7 = arith.constant 0 : index
    %4 = vector.load %arg3[%c0_5, %c0_6, %c0_7] : memref<8x8x16xf32, #tpu.memory_space<vmem>>, vector<8x8x16xf32>
    %cst_8 = arith.constant dense<0.000000e+00> : vector<8x16x16xf32>
    %5 = tpu.matmul %0, %3, %cst_8 {dimension_numbers = #tpu.dot_dimension_numbers<[1], [1], [2], [2], [0, 0, 0, 2, 1, 2], [0], [0]>} : vector<8x8x16xf32>, vector<8x8x16xf32>, vector<8x16x16xf32> -> vector<8x16x16xf32>
    %cst_9 = arith.constant dense<0xFF800000> : vector<8x16xf32>
    %6 = vector.multi_reduction <maximumf>, %5, %cst_9 [1] : vector<8x16x16xf32> to vector<8x16xf32>
    %7 = vector.shape_cast %6 : vector<8x16xf32> to vector<8x1x16xf32>
    %8 = vector.broadcast %7 : vector<8x1x16xf32> to vector<8x16x16xf32>
    %9 = arith.subf %5, %8 : vector<8x16x16xf32>
    %10 = math.exp %9 : vector<8x16x16xf32>
    %cst_10 = arith.constant dense<0.000000e+00> : vector<8x16xf32>
    %11 = vector.multi_reduction <add>, %10, %cst_10 [1] : vector<8x16x16xf32> to vector<8x16xf32>
    %12 = vector.shape_cast %11 : vector<8x16xf32> to vector<8x1x16xf32>
    %13 = tpu.reciprocal %12 {approx = true} : vector<8x1x16xf32> -> vector<8x1x16xf32>
    %14 = arith.mulf %12, %13 : vector<8x1x16xf32>
    %cst_11 = arith.constant 2.000000e+00 : f32
    %15 = vector.broadcast %cst_11 : f32 to vector<8x1x16xf32>
    %16 = arith.subf %15, %14 : vector<8x1x16xf32>
    %17 = arith.mulf %13, %16 : vector<8x1x16xf32>
    %18 = vector.broadcast %17 : vector<8x1x16xf32> to vector<8x16x16xf32>
    %19 = arith.mulf %10, %18 : vector<8x16x16xf32>
    %cst_12 = arith.constant dense<0.000000e+00> : vector<8x8x16xf32>
    %20 = tpu.matmul %4, %19, %cst_12 {dimension_numbers = #tpu.dot_dimension_numbers<[2], [1], [1], [2], [0, 0, 0, 1, 1, 2], [0], [0]>} : vector<8x8x16xf32>, vector<8x16x16xf32>, vector<8x8x16xf32> -> vector<8x8x16xf32>
    %21 = tpu.transpose %19, [1, 0, 2] : vector<8x16x16xf32> -> vector<16x8x16xf32>
    %22 = vector.shape_cast %21 : vector<16x8x16xf32> to vector<16x128xf32>
    %c0_13 = arith.constant 0 : index
    %c0_14 = arith.constant 0 : index
    %c0_15 = arith.constant 0 : index
    %23 = vector.load %arg5[%c0_13, %c0_14, %c0_15] : memref<1x16x128xf32, #tpu.memory_space<vmem>>, vector<1x16x128xf32>
    %24 = vector.shape_cast %23 : vector<1x16x128xf32> to vector<16x128xf32>
    %25 = vector.shape_cast %22 : vector<16x128xf32> to vector<1x16x128xf32>
    tpu.vector_store %arg5[%c0_13, %c0_14, %c0_15], %25 {strides = array<i32>} : memref<1x16x128xf32, #tpu.memory_space<vmem>>, vector<1x16x128xf32>,
    %26 = tpu.transpose %20, [1, 0, 2] : vector<8x8x16xf32> -> vector<8x8x16xf32>
    %27 = vector.shape_cast %26 : vector<8x8x16xf32> to vector<8x128xf32>
    %c0_16 = arith.constant 0 : index
    %c0_17 = arith.constant 0 : index
    %c0_18 = arith.constant 0 : index
    %28 = vector.load %arg4[%c0_16, %c0_17, %c0_18] : memref<1x8x128xf32, #tpu.memory_space<vmem>>, vector<1x8x128xf32>
    %29 = vector.shape_cast %28 : vector<1x8x128xf32> to vector<8x128xf32>
    %30 = vector.shape_cast %27 : vector<8x128xf32> to vector<1x8x128xf32>
    tpu.vector_store %arg4[%c0_16, %c0_17, %c0_18], %30 {strides = array<i32>} : memref<1x8x128xf32, #tpu.memory_space<vmem>>, vector<1x8x128xf32>,
    return
  }
  func.func @transform_0(%arg0: i32) -> (i32, i32, i32) {
    %c0_i32 = arith.constant 0 : i32
    %c0_i32_0 = arith.constant 0 : i32
    %c0_i32_1 = arith.constant 0 : i32
    return %arg0, %c0_i32, %c0_i32_0 : i32, i32, i32
  }
  func.func @transform_1(%arg0: i32) -> (i32, i32, i32) {
    %c0_i32 = arith.constant 0 : i32
    %c0_i32_0 = arith.constant 0 : i32
    %c0_i32_1 = arith.constant 0 : i32
    return %arg0, %c0_i32, %c0_i32_0 : i32, i32, i32
  }
  func.func @transform_2(%arg0: i32) -> (i32, i32, i32) {
    %c0_i32 = arith.constant 0 : i32
    %c0_i32_0 = arith.constant 0 : i32
    %c0_i32_1 = arith.constant 0 : i32
    return %arg0, %c0_i32, %c0_i32_0 : i32, i32, i32
  }
  func.func @transform_3(%arg0: i32) -> (i32, i32, i32) {
    %c0_i32 = arith.constant 0 : i32
    %c0_i32_0 = arith.constant 0 : i32
    %c0_i32_1 = arith.constant 0 : i32
    return %arg0, %c0_i32, %c0_i32_0 : i32, i32, i32
  }
  func.func @transform_4(%arg0: i32) -> (i32, i32, i32) {
    %c0_i32 = arith.constant 0 : i32
    %c0_i32_0 = arith.constant 0 : i32
    %c0_i32_1 = arith.constant 0 : i32
    return %arg0, %c0_i32, %c0_i32_0 : i32, i32, i32
  }
}

</mosaic_0001>

<bundles_post_ra>
// kernel: tpu_custom_call.1
= control target key start
LH: loop header
LB: loop body
LE: loop exit
PB: predicated region body
PF: predicated region fallthrough
CT: control target
= control target key end

     0   :  { %10 = vsyncpa [#allocation3], 0  ;;  %s3725_s0 = inlined_call_operand.hbm [shape: f32[8,8,16], index: 0, kind: input, shape index: {}]   ;;  %s3726_s1 = inlined_call_operand.hbm [shape: f32[8,8,16], index: 1, kind: input, shape index: {}]   ;;  %s3727_s2 = inlined_call_operand.hbm [shape: f32[8,8,16], index: 2, kind: input, shape index: {}]   ;;  %s3728_s3 = inlined_call_operand.hbm [shape: f32[1,8,128], index: 3, kind: output, shape index: {0}]   ;;  %s3729_s4 = inlined_call_operand.hbm [shape: f32[1,16,128], index: 4, kind: output, shape index: {1}]  }
   0x1   :  { %11 = vsyncpa [#allocation6], 0 }
   0x2   :  { %12 = vsyncpa [#allocation4], 0 }
   0x3   :  { %13 = vsyncpa [#allocation10], 0  ;;  %s3184_s15 = smov [#allocation5]   ;;  %s3185_s17 = smov [#allocation2]  }
   0x4   :  { %s31_s16 = sshll.u32 %s3184_s15, 4  ;;  %s19_s18 = sshll.u32 %s3185_s17, 4  ;;  %s32_s16 = int_to_ptr.vmem [resolvable:$true] %s31_s16  ;;  %s3228_s18 = int_to_ptr.vmem [resolvable:$true] %s19_s18 }
   0x5   :  { %s3066_s21 = scalar_lea.hbm %s3726_s1, 1024 }
   0x6   :  { %p3067_p0 = scmp.ne.s32.totalorder %s3726_s1, %s3066_s21  ;;  %p3070_p1 = scmp.lt.u32.totalorder %s3066_s21, %s3726_s1 }
   0x8   :  { %p3072_p2 = pnand %p3070_p1, %p3067_p0 }
   0xa   :  { %3075 = shalt.err (!%p3072_p2)
}
   0xb   :  { %s3076_s26 = scalar_lea.vmem %s32_s16, 1024  ;;  %p3081_p4 = scmp.lt.s32.totalorder %s32_s16, %s32_s16 }
   0xc   :  { %p3077_p3 = scmp.ne.s32.totalorder %s32_s16, %s3076_s26  ;;  %p3082_p5 = scmp.lt.s32.totalorder %s3076_s26, %s3076_s26 }
   0xe   :  { %p3083_p6 = por %p3082_p5, %p3081_p4 }
  0x10   :  { %p3084_p7 = pnand %p3083_p6, %p3077_p3 }
  0x12   :  { %3087 = shalt.err (!%p3084_p7)
}
  0x13   :  { %s3186_s27 = smov 128   ;;  %s3187_s28 = smov 8  }
  0x14   :  { %37 = dma.hbm_to_vmem [thread:$0]  %s3726_s1, 1024, %s32_s16, [#allocation6], %s3186_s27, %s3186_s27, %s3187_s28  }
  0x15   :  { %s3088_s7 = scalar_lea.hbm %s3725_s0, 1024 }
  0x16   :  { %p3089_p8 = scmp.ne.s32.totalorder %s3725_s0, %s3088_s7  ;;  %p3092_p9 = scmp.lt.u32.totalorder %s3088_s7, %s3725_s0 }
  0x18   :  { %p3094_p10 = pnand %p3092_p9, %p3089_p8 }
  0x1a   :  { %3097 = shalt.err (!%p3094_p10)
}
  0x1b   :  { %s3098_s12 = scalar_lea.vmem %s3228_s18, 1024  ;;  %p3103_p12 = scmp.lt.s32.totalorder %s3228_s18, %s3228_s18 }
  0x1c   :  { %p3099_p11 = scmp.ne.s32.totalorder %s3228_s18, %s3098_s12  ;;  %p3104_p13 = scmp.lt.s32.totalorder %s3098_s12, %s3098_s12 }
  0x1e   :  { %p3105_p0 = por %p3104_p13, %p3103_p12 }
  0x20   :  { %p3106_p1 = pnand %p3105_p0, %p3099_p11 }
  0x22   :  { %3109 = shalt.err (!%p3106_p1)
}
  0x23   :  { %25 = dma.hbm_to_vmem [thread:$0]  %s3725_s0, 1024, %s3228_s18, [#allocation3], %s3186_s27, %s3186_s27, %s3187_s28  }
  0x24   :  { %s3188_s14 = smov [#allocation7]   ;;  %s3110_s19 = scalar_lea.hbm %s3727_s2, 1024 }
  0x25   :  { %s43_s15 = sshll.u32 %s3188_s14, 4  ;;  %p3111_p2 = scmp.ne.s32.totalorder %s3727_s2, %s3110_s19  ;;  %s44_s15 = int_to_ptr.vmem [resolvable:$true] %s43_s15 }
  0x26   :  { %p3114_p3 = scmp.lt.u32.totalorder %s3110_s19, %s3727_s2 }
  0x28   :  { %p3116_p4 = pnand %p3114_p3, %p3111_p2 }
  0x2a   :  { %3119 = shalt.err (!%p3116_p4)
}
  0x2b   :  { %s3120_s24 = scalar_lea.vmem %s44_s15, 1024  ;;  %p3125_p6 = scmp.lt.s32.totalorder %s44_s15, %s44_s15 }
  0x2c   :  { %p3121_p5 = scmp.ne.s32.totalorder %s44_s15, %s3120_s24  ;;  %p3126_p7 = scmp.lt.s32.totalorder %s3120_s24, %s3120_s24 }
  0x2e   :  { %p3127_p8 = por %p3126_p7, %p3125_p6 }
  0x30   :  { %p3128_p9 = pnand %p3127_p8, %p3121_p5 }
  0x32   :  { %3131 = shalt.err (!%p3128_p9)
}
  0x33   :  { %49 = dma.hbm_to_vmem [thread:$0]  %s3727_s2, 1024, %s44_s15, [#allocation6], %s3186_s27, %s3186_s27, %s3187_s28  }
  0x34   :  { %3176 = dma.done.wait [#allocation3], 1024  }
  0x35   :  { %3177 = vsyncadd [#allocation3], 4294966272 }
  0x36   :  { %3178 = dma.done.wait [#allocation6], 2048  }
  0x37   :  { %3179 = vsyncadd [#allocation6], 4294965248  ;;  %v61_v0 = vld [vmem:[#allocation2 + $0x10] sm:$0xff]  ;;  %v59_v1 = vld [vmem:[#allocation2] sm:$0xff]  ;;  %vm123_vm0 = vcmask 64512   ;;  %v3189_v40 = vmov 0.0|0.0  }
  0x38   :  { %318 = vxpose.xlu1.b32.start.end [1/1] (short) (narrow) %v61_v0, 16  ;;  %91 = vxpose.xlu0.b32.start.end [1/1] (short) (narrow) %v59_v1, 16  ;;  %v67_v2 = vld [vmem:[#allocation5] sm:$0xff]  ;;  %v62_v3 = vld [vmem:[#allocation2 + $0x18] sm:$0xff]  ;;  %v60_v4 = vld [vmem:[#allocation2 + $0x8] sm:$0xff]  ;;  %vm3190_vm1 = vmmov 0  }
  0x39   :  { %v75_v5 = vmul.f32 0.17677669, %v67_v2  ;;  %v69_v6 = vld [vmem:[#allocation5 + $0x10] sm:$0xff]  ;;  %v64_v8 = vld [vmem:[#allocation2 + $0x28] sm:$0xff]  ;;  %v63_v9 = vld [vmem:[#allocation2 + $0x20] sm:$0xff]  ;;  %v3191_v41 = vmov 0.0  }
  0x3a   :  { %v77_v7 = vmul.f32 0.17677669, %v69_v6  ;;  %v68_v10 = vld [vmem:[#allocation5 + $0x8] sm:$0xff]  ;;  %v66_v12 = vld [vmem:[#allocation2 + $0x38] sm:$0xff]  ;;  %v65_v13 = vld [vmem:[#allocation2 + $0x30] sm:$0xff]  ;;  %vm996_vm2 = vcmask 130048  }
  0x3b   :  { %2879 = vmatprep.subr.mxu0 %v75_v5  ;;  %v76_v11 = vmul.f32 0.17677669, %v68_v10  ;;  %v70_v14 = vld [vmem:[#allocation5 + $0x18] sm:$0xff]  ;;  %v71_v18 = vld [vmem:[#allocation5 + $0x20] sm:$0xff]  ;;  %v73_v22 = vld [vmem:[#allocation5 + $0x30] sm:$0xff]  ;;  %s3194_s2 = smov 16  }
  0x3c   :  { %2880 = vmatpush3.msra.mxu0 %v75_v5  ;;  %v78_v15 = vmul.f32 0.17677669, %v70_v14  ;;  %v79_v19 = vmul.f32 0.17677669, %v71_v18  ;;  %v81_v23 = vmul.f32 0.17677669, %v73_v22 }
  0x3d   :  { %431 = vxpose.xlu1.b32.start.end [1/1] (short) (narrow) %v62_v3, 16  ;;  %205 = vxpose.xlu0.b32.start.end [1/1] (short) (narrow) %v60_v4, 16  ;;  %v72_v26 = vld [vmem:[#allocation5 + $0x28] sm:$0xff]  ;;  %v74_v30 = vld [vmem:[#allocation5 + $0x38] sm:$0xff]  ;;  %s3195_s25 = smov 32   ;;  %s3196_s26 = smov 48  }
  0x3e   :  { %2889 = vmatprep.subr.mxu0 %v77_v7  ;;  %2884 = vmatprep.subr.mxu1 %v76_v11  ;;  %v80_v27 = vmul.f32 0.17677669, %v72_v26  ;;  %v82_v31 = vmul.f32 0.17677669, %v74_v30  ;;  %s3197_s29 = smov 64   ;;  %s3198_s30 = smov 80  }
  0x3f   :  { %2885 = vmatpush3.msra.mxu1 %v76_v11  ;;  %s3199_s5 = smov 96   ;;  %s3200_s6 = smov 112   ;;  %vm2426_vm3 = vcmask 392192   ;;  %vm2423_vm4 = vcmask 261120   ;;  %vm2432_vm5 = vcmask 654336   ;;  %vm2429_vm6 = vcmask 523264  }
  0x40   :  { %2894 = vmatprep.subr.mxu1 %v78_v15  ;;  %vm2435_vm7 = vcmask 785408   ;;  %vm2438_vm8 = vcmask 916480   ;;  %s3201_s7 = smov [#allocation8]   ;;  %s3202_s9 = smov [#allocation9]  }
  0x41   :  { %s2757_s8 = sshll.u32 %s3201_s7, 4  ;;  %s2766_s10 = sshll.u32 %s3202_s9, 4  ;;  %s2758_s8 = int_to_ptr.vmem [resolvable:$true] %s2757_s8  ;;  %s3689_s10 = int_to_ptr.vmem [resolvable:$true] %s2766_s10 }
  0x42   :  { %657 = vxpose.xlu1.b32.start.end [1/1] (short) (narrow) %v64_v8, 16  ;;  %544 = vxpose.xlu0.b32.start.end [1/1] (short) (narrow) %v63_v9, 16  ;;  %s3132_s11 = scalar_lea.vmem %s2758_s8, 128  ;;  %p3137_p11 = scmp.lt.s32.totalorder %s2758_s8, %s2758_s8 }
  0x43   :  { %p3133_p10 = scmp.ne.s32.totalorder %s2758_s8, %s3132_s11  ;;  %p3138_p12 = scmp.lt.s32.totalorder %s3132_s11, %s3132_s11 }
  0x45   :  { %p3139_p13 = por %p3138_p12, %p3137_p11 }
  0x47   :  { %883 = vxpose.xlu1.b32.start.end [1/1] (short) (narrow) %v66_v12, 16  ;;  %770 = vxpose.xlu0.b32.start.end [1/1] (short) (narrow) %v65_v13, 16  ;;  %p3140_p0 = pnand %p3139_p13, %p3133_p10 }
  0xb8   :  { %v334_v16 = vpop.trf.xlu1  ;;  %v107_v17 = vpop.trf.xlu0 }
  0xb9   :  { %2881 = vmatprep.mubr.msk.f32.mxu0 %vm123_vm0, %v107_v17 }
  0xbc   :  { %v335_v20 = vpop.trf.xlu1  ;;  %v108_v21 = vpop.trf.xlu0 }
  0xbd   :  { %2882 = vmatmul.mubr.msk.f32.vlgmr.msra.gmra.mrb[0].mxu0 %vm123_vm0, %v108_v21 }
  0xbe   :  { %2891 = vmatprep.mubr.msk.f32.mxu0 %vm123_vm0, %v334_v16  ;;  %2890 = vmatpush3.msra.mxu0 %v77_v7 }
  0xbf   :  { %2899 = vmatprep.subr.mxu0 %v79_v19 }
  0xc0   :  { %v447_v24 = vpop.trf.xlu1  ;;  %v221_v25 = vpop.trf.xlu0 }
  0xc1   :  { %2886 = vmatprep.mubr.msk.f32.mxu1 %vm123_vm0, %v221_v25  ;;  %2892 = vmatmul.mubr.msk.f32.vlgmr.msra.gmra.mrb[2].mxu0 %vm123_vm0, %v335_v20 }
  0xc2   :  { %2900 = vmatpush3.msra.mxu0 %v79_v19 }
  0xc3   :  { %2909 = vmatprep.subr.mxu0 %v81_v23 }
  0xc4   :  { %v448_v28 = vpop.trf.xlu1  ;;  %v222_v29 = vpop.trf.xlu0 }
  0xc5   :  { %2887 = vmatmul.mubr.msk.f32.vlgmr.msra.gmra.mrb[0].mxu1 %vm123_vm0, %v222_v29 }
  0xc6   :  { %2896 = vmatprep.mubr.msk.f32.mxu1 %vm123_vm0, %v447_v24  ;;  %2895 = vmatpush3.msra.mxu1 %v78_v15 }
  0xc7   :  { %2904 = vmatprep.subr.mxu1 %v80_v27 }
  0xc8   :  { %v673_v32 = vpop.trf.xlu1  ;;  %v560_v33 = vpop.trf.xlu0 }
  0xc9   :  { %2897 = vmatmul.mubr.msk.f32.vlgmr.msra.gmra.mrb[2].mxu1 %vm123_vm0, %v448_v28  ;;  %2901 = vmatprep.mubr.msk.f32.mxu0 %vm123_vm0, %v560_v33 }
  0xca   :  { %2906 = vmatprep.mubr.msk.f32.mxu1 %vm123_vm0, %v673_v32  ;;  %2905 = vmatpush3.msra.mxu1 %v80_v27 }
  0xcb   :  { %2914 = vmatprep.subr.mxu1 %v82_v31 }
  0xcc   :  { %v674_v34 = vpop.trf.xlu1  ;;  %v561_v35 = vpop.trf.xlu0 }
  0xcd   :  { %2902 = vmatmul.mubr.msk.f32.vlgmr.msra.gmra.mrb[4].mxu0 %vm123_vm0, %v561_v35  ;;  %2907 = vmatmul.mubr.msk.f32.vlgmr.msra.gmra.mrb[4].mxu1 %vm123_vm0, %v674_v34 }
  0xce   :  { %2910 = vmatpush3.msra.mxu0 %v81_v23  ;;  %2915 = vmatpush3.msra.mxu1 %v82_v31 }
  0xcf   :  { %2975 = vmatprep.subr.bf16.mxu0 %v3189_v40  ;;  %2978 = vmatprep.subr.bf16.mxu1 %v3189_v40 }
  0xd0   :  { %v899_v36 = vpop.trf.xlu1  ;;  %v786_v37 = vpop.trf.xlu0 }
  0xd1   :  { %2911 = vmatprep.mubr.msk.f32.mxu0 %vm123_vm0, %v786_v37  ;;  %2916 = vmatprep.mubr.msk.f32.mxu1 %vm123_vm0, %v899_v36 }
  0xd4   :  { %v900_v38 = vpop.trf.xlu1  ;;  %v787_v39 = vpop.trf.xlu0 }
  0xd5   :  { %2912 = vmatmul.mubr.msk.f32.vlgmr.msra.gmra.mrb[6].mxu0 %vm123_vm0, %v787_v39  ;;  %2917 = vmatmul.mubr.msk.f32.vlgmr.msra.gmra.mrb[6].mxu1 %vm123_vm0, %v900_v38 }
  0xd6   :  { %2923 = vmatprep.mubr.msk.f32.mxu0 %vm3190_vm1, %v3191_v41  ;;  %2930 = vmatprep.mubr.msk.f32.mxu1 %vm3190_vm1, %v3191_v41 }
 0x190   :  { %v2883_v42 = vpop.f32.mrb[0].mxu0 }
 0x191   :  { %v998_v43 = vsel %vm996_vm2, %v2883_v42, -inf  ;;  %v196_v44 = vpop.f32.mrb[1].mxu0 }
 0x192   :  { %v997_v45 = vsel %vm996_vm2, %v196_v44, -inf }
 0x193   :  { %v999_v46 = vmax.f32 %v997_v45, %v998_v43 }
 0x194   :  { %v2893_v47 = vpop.f32.mrb[2].mxu0 }
 0x195   :  { %v1000_v48 = vrot.slane %v999_v46, 4  ;;  %v1016_v49 = vsel %vm996_vm2, %v2893_v47, -inf  ;;  %v422_v50 = vpop.f32.mrb[3].mxu0 }
 0x196   :  { %v1015_v51 = vsel %vm996_vm2, %v422_v50, -inf }
 0x197   :  { %v1001_v52 = vmax.f32 %v999_v46, %v1000_v48  ;;  %v1017_v53 = vmax.f32 %v1015_v51, %v1016_v49 }
 0x198   :  { %v3306_v54 = vpop.f32.mrb[0].mxu1 }
 0x199   :  { %v1002_v55 = vrot.slane %v1001_v52, 2  ;;  %v1018_v56 = vrot.slane %v1017_v53, 4  ;;  %v1007_v57 = vsel %vm996_vm2, %v3306_v54, -inf  ;;  %v309_v58 = vpop.f32.mrb[1].mxu1 }
 0x19a   :  { %v1006_v59 = vsel %vm996_vm2, %v309_v58, -inf }
 0x19b   :  { %v1003_v60 = vmax.f32 %v1001_v52, %v1002_v55  ;;  %v1019_v61 = vmax.f32 %v1017_v53, %v1018_v56  ;;  %v1008_v62 = vmax.f32 %v1006_v59, %v1007_v57 }
 0x19c   :  { %v3311_v63 = vpop.f32.mrb[2].mxu1 }
 0x19d   :  { %v1004_v0 = vrot.slane %v1003_v60, 1  ;;  %v1020_v1 = vrot.slane %v1019_v61, 2  ;;  %v1009_v2 = vrot.slane %v1008_v62, 4  ;;  %v1025_v3 = vsel %vm996_vm2, %v3311_v63, -inf  ;;  %v3315_v4 = vpop.f32.mrb[3].mxu1 }
 0x19e   :  { %v1024_v5 = vsel %vm996_vm2, %v3315_v4, -inf }
 0x19f   :  { %v1005_v6 = vmax.f32 %v1003_v60, %v1004_v0  ;;  %v1021_v7 = vmax.f32 %v1019_v61, %v1020_v1  ;;  %v1010_v8 = vmax.f32 %v1008_v62, %v1009_v2  ;;  %v1026_v9 = vmax.f32 %v1024_v5, %v1025_v3 }
 0x1a0   :  { %v3319_v10 = vpop.f32.mrb[4].mxu0  ;;  %v3321_v11 = vpop.f32.mrb[4].mxu1 }
 0x1a1   :  { %v1069_v12 = vsub.f32 %v196_v44, %v1005_v6  ;;  %v1070_v13 = vsub.f32 %v2883_v42, %v1005_v6  ;;  %v1022_v14 = vrot.slane %v1021_v7, 1  ;;  %v1011_v15 = vrot.slane %v1010_v8, 2  ;;  %v3323_v16 = vpop.f32.mrb[5].mxu0  ;;  %v3325_v17 = vpop.f32.mrb[5].mxu1 }
 0x1a2   :  { %v1027_v18 = vrot.slane %v1026_v9, 4  ;;  %v1034_v19 = vsel %vm996_vm2, %v3319_v10, -inf  ;;  %v1043_v20 = vsel %vm996_vm2, %v3321_v11, -inf  ;;  %v1033_v21 = vsel %vm996_vm2, %v3323_v16, -inf }
 0x1a3   :  { %v1085_v22 = vmul.f32 1.442695, %v1069_v12  ;;  %v1087_v23 = vmul.f32 1.442695, %v1070_v13  ;;  %v1023_v24 = vmax.f32 %v1021_v7, %v1022_v14  ;;  %v1012_v25 = vmax.f32 %v1010_v8, %v1011_v15 }
 0x1a4   :  { %v1028_v26 = vmax.f32 %v1026_v9, %v1027_v18  ;;  %v1035_v27 = vmax.f32 %v1033_v21, %v1034_v19  ;;  %v1042_v28 = vsel %vm996_vm2, %v3325_v17, -inf }
 0x1a5   :  { %3018 = vpow2.f32 %v1085_v22  ;;  %v1073_v29 = vsub.f32 %v422_v50, %v1023_v24  ;;  %v1074_v30 = vsub.f32 %v2893_v47, %v1023_v24  ;;  %v1013_v31 = vrot.slane %v1012_v25, 1 }
 0x1a6   :  { %3020 = vpow2.f32 %v1087_v23  ;;  %v1029_v32 = vrot.slane %v1028_v26, 2  ;;  %v1036_v33 = vrot.slane %v1035_v27, 4  ;;  %v1044_v34 = vmax.f32 %v1042_v28, %v1043_v20 }
 0x1a7   :  { %v1093_v35 = vmul.f32 1.442695, %v1073_v29  ;;  %v1095_v36 = vmul.f32 1.442695, %v1074_v30  ;;  %v1014_v37 = vmax.f32 %v1012_v25, %v1013_v31 }
 0x1a8   :  { %v1030_v38 = vmax.f32 %v1028_v26, %v1029_v32  ;;  %v1037_v39 = vmax.f32 %v1035_v27, %v1036_v33  ;;  %v1045_v42 = vrot.slane %v1044_v34, 4  ;;  %v3335_v43 = vpop.f32.mrb[6].mxu0  ;;  %v3337_v44 = vpop.f32.mrb[6].mxu1 }
 0x1a9   :  { %3022 = vpow2.f32 %v1093_v35  ;;  %v1071_v45 = vsub.f32 %v309_v58, %v1014_v37  ;;  %v1072_v46 = vsub.f32 %v3306_v54, %v1014_v37  ;;  %v1052_v47 = vsel %vm996_vm2, %v3335_v43, -inf  ;;  %v3342_v48 = vpop.f32.mrb[7].mxu0  ;;  %v3344_v49 = vpop.f32.mrb[7].mxu1 }
 0x1aa   :  { %3024 = vpow2.f32 %v1095_v36  ;;  %v1031_v50 = vrot.slane %v1030_v38, 1  ;;  %v1038_v51 = vrot.slane %v1037_v39, 2  ;;  %v1046_v52 = vmax.f32 %v1044_v34, %v1045_v42 }
 0x1ab   :  { %v1089_v53 = vmul.f32 1.442695, %v1071_v45  ;;  %v1091_v55 = vmul.f32 1.442695, %v1072_v46  ;;  %v1061_v56 = vsel %vm996_vm2, %v3337_v44, -inf  ;;  %v1051_v57 = vsel %vm996_vm2, %v3342_v48, -inf }
 0x1ac   :  { %v1032_v54 = vmax.f32 %v1030_v38, %v1031_v50  ;;  %v1039_v58 = vmax.f32 %v1037_v39, %v1038_v51  ;;  %v1047_v59 = vrot.slane %v1046_v52, 2  ;;  %v1053_v60 = vmax.f32 %v1051_v57, %v1052_v47 }
 0x1ad   :  { %3026 = vpow2.f32 %v1089_v53  ;;  %v1060_v61 = vsel %vm996_vm2, %v3344_v49, -inf }
 0x1ae   :  { %3028 = vpow2.f32 %v1091_v55  ;;  %v1075_v62 = vsub.f32 %v3315_v4, %v1032_v54  ;;  %v1076_v0 = vsub.f32 %v3311_v63, %v1032_v54  ;;  %v1040_v1 = vrot.slane %v1039_v58, 1 }
 0x1af   :  { %v3354_v2 = vpop.eup %3018  ;;  %v1048_v3 = vmax.f32 %v1046_v52, %v1047_v59  ;;  %v1054_v5 = vrot.slane %v1053_v60, 4  ;;  %v1062_v6 = vmax.f32 %v1060_v61, %v1061_v56 }
 0x1b0   :  { %v3356_v7 = vpop.eup %3020  ;;  %v1117_v8 = vsel %vm996_vm2, %v3354_v2, 0.0  ;;  %v1097_v9 = vmul.f32 1.442695, %v1075_v62  ;;  %v1099_v12 = vmul.f32 1.442695, %v1076_v0  ;;  %v1041_v13 = vmax.f32 %v1039_v58, %v1040_v1 }
 0x1b1   :  { %v1118_v14 = vsel %vm996_vm2, %v3356_v7, 0.0  ;;  %v1049_v4 = vrot.slane %v1048_v3, 1  ;;  %v1055_v15 = vmax.f32 %v1053_v60, %v1054_v5  ;;  %v1063_v63 = vrot.slane %v1062_v6, 4 }
 0x1b2   :  { %v1119_v18 = vadd.f32 %v1118_v14, %v1117_v8  ;;  %3030 = vpow2.f32 %v1097_v9  ;;  %v1077_v19 = vsub.f32 %v3323_v16, %v1041_v13  ;;  %v1078_v20 = vsub.f32 %v3319_v10, %v1041_v13 }
 0x1b3   :  { %v3364_v21 = vpop.eup %3022  ;;  %3032 = vpow2.f32 %v1099_v12  ;;  %v1050_v22 = vmax.f32 %v1048_v3, %v1049_v4  ;;  %v1056_v23 = vrot.slane %v1055_v15, 2  ;;  %v1064_v24 = vmax.f32 %v1062_v6, %v1063_v63 }
 0x1b4   :  { %v3366_v25 = vpop.eup %3024  ;;  %v1120_v26 = vrot.slane %v1119_v18, 4  ;;  %v1135_v27 = vsel %vm996_vm2, %v3364_v21, 0.0  ;;  %v1101_v28 = vmul.f32 1.442695, %v1077_v19  ;;  %v1103_v29 = vmul.f32 1.442695, %v1078_v20 }
 0x1b5   :  { %v1136_v30 = vsel %vm996_vm2, %v3366_v25, 0.0  ;;  %v1079_v16 = vsub.f32 %v3325_v17, %v1050_v22  ;;  %v1080_v10 = vsub.f32 %v3321_v11, %v1050_v22  ;;  %v1057_v31 = vmax.f32 %v1055_v15, %v1056_v23 }
 0x1b6   :  { %v1121_v32 = vadd.f32 %v1120_v26, %v1119_v18  ;;  %v1137_v33 = vadd.f32 %v1136_v30, %v1135_v27  ;;  %3034 = vpow2.f32 %v1101_v28  ;;  %v1065_v34 = vrot.slane %v1064_v24, 2 }
 0x1b7   :  { %v3374_v35 = vpop.eup %3026  ;;  %3036 = vpow2.f32 %v1103_v29  ;;  %v1105_v36 = vmul.f32 1.442695, %v1079_v16  ;;  %v1107_v37 = vmul.f32 1.442695, %v1080_v10  ;;  %v1058_v38 = vrot.slane %v1057_v31, 1 }
 0x1b8   :  { %v3376_v39 = vpop.eup %3028  ;;  %v1122_v42 = vrot.slane %v1121_v32, 2  ;;  %v1138_v45 = vrot.slane %v1137_v33, 4  ;;  %v1126_v17 = vsel %vm996_vm2, %v3374_v35, 0.0  ;;  %v1066_v46 = vmax.f32 %v1064_v24, %v1065_v34 }
 0x1b9   :  { %v1127_v11 = vsel %vm996_vm2, %v3376_v39, 0.0  ;;  %3038 = vpow2.f32 %v1105_v36  ;;  %v1059_v47 = vmax.f32 %v1057_v31, %v1058_v38 }
 0x1ba   :  { %v1123_v50 = vadd.f32 %v1122_v42, %v1121_v32  ;;  %v1139_v51 = vadd.f32 %v1138_v45, %v1137_v33  ;;  %v1128_v52 = vadd.f32 %v1127_v11, %v1126_v17  ;;  %3040 = vpow2.f32 %v1107_v37 }
 0x1bb   :  { %v1081_v53 = vsub.f32 %v3342_v48, %v1059_v47  ;;  %v1082_v55 = vsub.f32 %v3335_v43, %v1059_v47  ;;  %v1067_v56 = vrot.slane %v1066_v46, 1 }
 0x1bc   :  { %v3384_v57 = vpop.eup %3030  ;;  %v1140_v54 = vrot.slane %v1139_v51, 2  ;;  %v1129_v58 = vrot.slane %v1128_v52, 4  ;;  %v1124_v59 = vrot.slane %v1123_v50, 1 }
 0x1bd   :  { %v3386_v60 = vpop.eup %3032  ;;  %v1144_v61 = vsel %vm996_vm2, %v3384_v57, 0.0  ;;  %v1109_v62 = vmul.f32 1.442695, %v1081_v53  ;;  %v1111_v0 = vmul.f32 1.442695, %v1082_v55  ;;  %v1068_v1 = vmax.f32 %v1066_v46, %v1067_v56 }
 0x1be   :  { %v1141_v3 = vadd.f32 %v1140_v54, %v1139_v51  ;;  %v1130_v5 = vadd.f32 %v1129_v58, %v1128_v52  ;;  %v1145_v48 = vsel %vm996_vm2, %v3386_v60, 0.0  ;;  %v1125_v43 = vadd.f32 %v1124_v59, %v1123_v50 }
 0x1bf   :  { %v1146_v6 = vadd.f32 %v1145_v48, %v1144_v61  ;;  %3042 = vpow2.f32 %v1109_v62  ;;  %v1083_v8 = vsub.f32 %v3344_v49, %v1068_v1  ;;  %v1084_v9 = vsub.f32 %v3337_v44, %v1068_v1 }
 0x1c0   :  { %v3394_v12 = vpop.eup %3034  ;;  %v1131_v13 = vrot.slane %v1130_v5, 2  ;;  %3044 = vpow2.f32 %v1111_v0  ;;  %v1142_v14 = vrot.slane %v1141_v3, 1 }
 0x1c1   :  { %v3396_v4 = vpop.eup %3036  ;;  %v1147_v15 = vrot.slane %v1146_v6, 4  ;;  %v1153_v63 = vsel %vm996_vm2, %v3394_v12, 0.0  ;;  %v1113_v18 = vmul.f32 1.442695, %v1083_v8  ;;  %v1115_v19 = vmul.f32 1.442695, %v1084_v9 }
 0x1c2   :  { %v1132_v20 = vadd.f32 %v1131_v13, %v1130_v5  ;;  %v1154_v22 = vsel %vm996_vm2, %v3396_v4, 0.0  ;;  %3046 = vrcp.f32 %v1125_v43  ;;  %v1143_v49 = vadd.f32 %v1142_v14, %v1141_v3 }
 0x1c3   :  { %v3402_v44 = vpop.eup %3038  ;;  %v1148_v23 = vadd.f32 %v1147_v15, %v1146_v6  ;;  %v1155_v24 = vadd.f32 %v1154_v22, %v1153_v63  ;;  %3048 = vpow2.f32 %v1113_v18  ;;  %v3192_v9 = vmov 1983009808  }
 0x1c4   :  { %v3404_v26 = vpop.eup %3040  ;;  %v1162_v27 = vsel %vm996_vm2, %v3402_v44, 0.0  ;;  %3050 = vpow2.f32 %v1115_v19  ;;  %v1133_v28 = vrot.slane %v1132_v20, 1  ;;  %v1824_v13 = vunpack.c.l.s4 %v3192_v9 }
 0x1c5   :  { %v1149_v29 = vrot.slane %v1148_v23, 2  ;;  %v1156_v30 = vrot.slane %v1155_v24, 4  ;;  %v1163_v16 = vsel %vm996_vm2, %v3404_v26, 0.0  ;;  %3052 = vrcp.f32 %v1143_v49 }
 0x1c6   :  { %v1164_v10 = vadd.f32 %v1163_v16, %v1162_v27  ;;  %v1134_v31 = vadd.f32 %v1133_v28, %v1132_v20  ;;  %v1826_v14 = vlaneseq }
 0x1c7   :  { %v1150_v32 = vadd.f32 %v1149_v29, %v1148_v23  ;;  %v1157_v33 = vadd.f32 %v1156_v30, %v1155_v24 }
 0x1c8   :  { %v1165_v34 = vrot.slane %v1164_v10, 4  ;;  %3054 = vrcp.f32 %v1134_v31 }
 0x1c9   :  { %v3410_v36 = vpop.eup %3042  ;;  %v1158_v37 = vrot.slane %v1157_v33, 2  ;;  %v1151_v38 = vrot.slane %v1150_v32, 1 }
 0x1ca   :  { %v3412_v42 = vpop.eup %3044  ;;  %v1166_v45 = vadd.f32 %v1165_v34, %v1164_v10  ;;  %v1171_v17 = vsel %vm996_vm2, %v3410_v36, 0.0 }
 0x1cb   :  { %v1159_v46 = vadd.f32 %v1158_v37, %v1157_v33  ;;  %v1172_v11 = vsel %vm996_vm2, %v3412_v42, 0.0  ;;  %v1152_v47 = vadd.f32 %v1151_v38, %v1150_v32  ;;  %v1827_v37 = vshrl.u32 %v1826_v14, 7 }
 0x1cc   :  { %v3047_v50 = vpop.eup %3046  ;;  %v1167_v51 = vrot.slane %v1166_v45, 2  ;;  %v1173_v52 = vadd.f32 %v1172_v11, %v1171_v17  ;;  %v3193_v38 = vmov 1934713408  }
 0x1cd   :  { %v3418_v53 = vpop.eup %3048  ;;  %v1197_v55 = vmul.f32 %v3047_v50, %v1125_v43  ;;  %3056 = vrcp.f32 %v1152_v47  ;;  %v1160_v56 = vrot.slane %v1159_v46, 1 }
 0x1ce   :  { %v3420_v54 = vpop.eup %3050  ;;  %v1168_v58 = vadd.f32 %v1167_v51, %v1166_v45  ;;  %v1174_v59 = vrot.slane %v1173_v52, 4  ;;  %v1180_v61 = vsel %vm996_vm2, %v3418_v53, 0.0  ;;  %v1888_v45 = vunpack.c.l.s4 %v3193_v38 }
 0x1cf   :  { %v3053_v62 = vpop.eup %3052  ;;  %v1181_v0 = vsel %vm996_vm2, %v3420_v54, 0.0  ;;  %v1205_v1 = vsub.f32 2.0, %v1197_v55  ;;  %v1161_v3 = vadd.f32 %v1160_v56, %v1159_v46 }
 0x1d0   :  { %v1175_v5 = vadd.f32 %v1174_v59, %v1173_v52  ;;  %v1182_v48 = vadd.f32 %v1181_v0, %v1180_v61  ;;  %v1199_v6 = vmul.f32 %v3053_v62, %v1143_v49  ;;  %v1169_v8 = vrot.slane %v1168_v58, 1 }
 0x1d1   :  { %v1213_v43 = vmul.f32 %v3047_v50, %v1205_v1  ;;  %3058 = vrcp.f32 %v1161_v3  ;;  %v1889_v0 = vunpack.c.0.s8 %v1888_v45  ;;  %v87_v45 = vld [vmem:[#allocation7 + $0x20] sm:$0xff] }
 0x1d2   :  { %v3055_v15 = vpop.eup %3054  ;;  %v1176_v63 = vrot.slane %v1175_v5, 2  ;;  %v1183_v18 = vrot.slane %v1182_v48, 4  ;;  %v1207_v19 = vsub.f32 2.0, %v1199_v6  ;;  %v1170_v20 = vadd.f32 %v1169_v8, %v1168_v58 }
 0x1d3   :  { %v3427_v22 = vmul.f32 %v3354_v2, %v1213_v43  ;;  %v3430_v23 = vmul.f32 %v3356_v7, %v1213_v43  ;;  %v1198_v24 = vmul.f32 %v3055_v15, %v1134_v31  ;;  %v83_v7 = vld [vmem:[#allocation7] sm:$0xff]  ;;  %v1825_v31 = vunpack.c.0.s8 %v1824_v13 }
 0x1d4   :  { %v1177_v27 = vadd.f32 %v1176_v63, %v1175_v5  ;;  %v1184_v49 = vadd.f32 %v1183_v18, %v1182_v48  ;;  %v1215_v28 = vmul.f32 %v3053_v62, %v1207_v19  ;;  %3060 = vrcp.f32 %v1170_v20  ;;  %v85_v62 = vld [vmem:[#allocation7 + $0x10] sm:$0xff] }
 0x1d5   :  { %v2976_v29 = vpack.c.bf16 %v3430_v23, %v3427_v22  ;;  %v1206_v30 = vsub.f32 2.0, %v1198_v24  ;;  %v3452_v48 = vsub.s32 %v1825_v31, %v1827_v37  ;;  %v3461_v14 = vsub.s32 %v1889_v0, %v1827_v37 }
 0x1d6   :  { %v1185_v16 = vrot.slane %v1184_v49, 2  ;;  %v3435_v10 = vmul.f32 %v3364_v21, %v1215_v28  ;;  %v1226_v32 = vmul.f32 %v3366_v25, %v1215_v28  ;;  %v1178_v2 = vrot.slane %v1177_v27, 1  ;;  %v86_v28 = vld [vmem:[#allocation7 + $0x18] sm:$0xff] }
 0x1d7   :  { %v3057_v33 = vpop.eup %3056  ;;  %2977 = vmatpush3.bf16.msra.mxu0 %v2976_v29  ;;  %v1214_v34 = vmul.f32 %v3055_v15, %v1206_v30 }
 0x1d8   :  { %v1186_v17 = vadd.f32 %v1185_v16, %v1184_v49  ;;  %2981 = vmatprep.subr.bf16.mxu0 %v3189_v40  ;;  %v2982_v46 = vpack.c.bf16 %v1226_v32, %v3435_v10  ;;  %v1821_v21 = vcombine.low %v3427_v22, %v3435_v10  ;;  %v1822_v25 = vcombine.high %v3427_v22, %v3435_v10 }
 0x1d9   :  { %v1957_v11 = vcombine.low %v3430_v23, %v1226_v32  ;;  %v1958_v50 = vcombine.high %v3430_v23, %v1226_v32  ;;  %v1223_v51 = vmul.f32 %v3374_v35, %v1214_v34  ;;  %v1224_v52 = vmul.f32 %v3376_v39, %v1214_v34  ;;  %v84_v39 = vld [vmem:[#allocation7 + $0x8] sm:$0xff] }
 0x1da   :  { %2924 = vmatmul.mubr.msk.f32.vlgmr.msra.gmra.mrb[8].mxu0 %vm996_vm2, %v83_v7  ;;  %v1200_v55 = vmul.f32 %v3057_v33, %v1152_v47  ;;  %v1179_v56 = vadd.f32 %v1178_v2, %v1177_v27  ;;  %v1187_v58 = vrot.slane %v1186_v17, 1  ;;  %v1829_v19 = vrot.slane %v1821_v21, %v3452_v48 }
 0x1db   :  { %v3059_v59 = vpop.eup %3058  ;;  %2983 = vmatpush3.bf16.msra.mxu0 %v2982_v46  ;;  %v2979_v61 = vpack.c.bf16 %v1224_v52, %v1223_v51  ;;  %2937 = vmatprep.mubr.msk.f32.mxu0 %vm3190_vm1, %v3191_v41  ;;  %v1965_v63 = vrot.slane %v1957_v11, %v3452_v48  ;;  %v1972_v18 = vrot.slane %v1958_v50, %v3452_v48  ;;  %v88_v11 = vld [vmem:[#allocation7 + $0x28] sm:$0xff] }
 0x1dc   :  { %v1208_v1 = vsub.f32 2.0, %v1200_v55  ;;  %2987 = vmatprep.subr.bf16.mxu0 %v3189_v40  ;;  %v1201_v5 = vmul.f32 %v3059_v59, %v1161_v3  ;;  %3062 = vrcp.f32 %v1179_v56  ;;  %v1188_v35 = vadd.f32 %v1187_v58, %v1186_v17 }
 0x1dd   :  { %2980 = vmatpush3.bf16.msra.mxu1 %v2979_v61  ;;  %v3476_v30 = vrot.slane %v1822_v25, %v3452_v48 }
 0x1de   :  { %v3061_v47 = vpop.eup %3060  ;;  %2984 = vmatprep.subr.bf16.mxu1 %v3189_v40  ;;  %v1216_v6 = vmul.f32 %v3057_v33, %v1208_v1  ;;  %2938 = vmatmul.mubr.msk.f32.vlgmr.msra.gmra.mrb[10].mxu0 %vm996_vm2, %v85_v62  ;;  %v1209_v8 = vsub.f32 2.0, %v1201_v5  ;;  %3064 = vrcp.f32 %v1188_v35 }
 0x1df   :  { %v1202_v43 = vmul.f32 %v3061_v47, %v1170_v20  ;;  %2951 = vmatprep.mubr.msk.f32.mxu0 %vm3190_vm1, %v3191_v41 }
 0x1e0   :  { %2931 = vmatmul.mubr.msk.f32.vlgmr.msra.gmra.mrb[8].mxu1 %vm996_vm2, %v84_v39  ;;  %v1227_v3 = vmul.f32 %v3384_v57, %v1216_v6  ;;  %v1228_v9 = vmul.f32 %v3386_v60, %v1216_v6  ;;  %v1217_v13 = vmul.f32 %v3059_v59, %v1209_v8 }
 0x1e1   :  { %2944 = vmatprep.mubr.msk.f32.mxu1 %vm3190_vm1, %v3191_v41  ;;  %v1210_v15 = vsub.f32 2.0, %v1202_v43 }
 0x1e2   :  { %v2985_v20 = vpack.c.bf16 %v1228_v9, %v1227_v3  ;;  %v1837_v22 = vcombine.low %v1223_v51, %v1227_v3  ;;  %v1838_v23 = vcombine.high %v1223_v51, %v1227_v3  ;;  %v1973_v24 = vcombine.low %v1224_v52, %v1228_v9 }
 0x1e3   :  { %v1974_v57 = vcombine.high %v1224_v52, %v1228_v9  ;;  %v3469_v60 = vmul.f32 %v3394_v12, %v1217_v13  ;;  %v3472_v27 = vmul.f32 %v3396_v4, %v1217_v13  ;;  %v1218_v49 = vmul.f32 %v3061_v47, %v1210_v15 }
 0x1e4   :  { %2986 = vmatpush3.bf16.msra.mxu1 %v2985_v20  ;;  %v1981_v29 = vrot.slane %v1973_v24, %v3452_v48  ;;  %v1845_v16 = vrot.slane %v1837_v22, %v3452_v48  ;;  %v3480_v10 = vrot.slane %v1838_v23, %v3452_v48  ;;  %v89_v23 = vld [vmem:[#allocation7 + $0x30] sm:$0xff] }
 0x1e5   :  { %2990 = vmatprep.subr.bf16.mxu1 %v3189_v40  ;;  %v2988_v12 = vpack.c.bf16 %v3472_v27, %v3469_v60  ;;  %v3486_v4 = vmul.f32 %v3402_v44, %v1218_v49  ;;  %v3489_v32 = vmul.f32 %v3404_v26, %v1218_v49  ;;  %v1988_v2 = vrot.slane %v1974_v57, %v3452_v48 }
 0x1e6   :  { %v3063_v33 = vpop.eup %3062  ;;  %v2021_v7 = vcombine.low %v1965_v63, %v1981_v29  ;;  %v2022_v34 = vcombine.high %v1965_v63, %v1981_v29  ;;  %v1885_v31 = vcombine.low %v1829_v19, %v1845_v16  ;;  %v1886_v37 = vcombine.high %v1829_v19, %v1845_v16 }
 0x1e7   :  { %2945 = vmatmul.mubr.msk.f32.vlgmr.msra.gmra.mrb[10].mxu1 %vm996_vm2, %v86_v28  ;;  %2989 = vmatpush3.bf16.msra.mxu0 %v2988_v12  ;;  %v2991_v38 = vpack.c.bf16 %v3489_v32, %v3486_v4  ;;  %v1203_v17 = vmul.f32 %v3063_v33, %v1179_v56  ;;  %v2037_v44 = vcombine.low %v1972_v18, %v1988_v2  ;;  %v90_v12 = vld [vmem:[#allocation7 + $0x38] sm:$0xff] }
 0x1e8   :  { %v3065_v46 = vpop.eup %3064  ;;  %2958 = vmatprep.mubr.msk.f32.mxu1 %vm3190_vm1, %v3191_v41  ;;  %2993 = vmatprep.subr.bf16.mxu0 %v3189_v40  ;;  %v2029_v26 = vrot.slane %v2021_v7, %v3461_v14  ;;  %v2036_v21 = vrot.slane %v2022_v34, %v3461_v14  ;;  %v2038_v25 = vcombine.high %v1972_v18, %v1988_v2 }
 0x1e9   :  { %2992 = vmatpush3.bf16.msra.mxu1 %v2991_v38  ;;  %v1211_v50 = vsub.f32 2.0, %v1203_v17  ;;  %v1204_v51 = vmul.f32 %v3065_v46, %v1188_v35  ;;  %v2045_v52 = vrot.slane %v2037_v44, %v3461_v14  ;;  %v1893_v55 = vrot.slane %v1885_v31, %v3461_v14 }
 0x1ea   :  { %2952 = vmatmul.mubr.msk.f32.vlgmr.msra.gmra.mrb[12].mxu0 %vm996_vm2, %v87_v45  ;;  %2996 = vmatprep.subr.bf16.mxu1 %v3189_v40  ;;  %v2052_v56 = vrot.slane %v2038_v25, %v3461_v14  ;;  %v2815_v58 = vcombine.low %v2029_v26, %v2036_v21  ;;  %v2817_v59 = vcombine.high %v2029_v26, %v2036_v21 }
 0x1eb   :  { %v1219_v61 = vmul.f32 %v3063_v33, %v1211_v50  ;;  %v1212_v62 = vsub.f32 2.0, %v1204_v51  ;;  %2965 = vmatprep.mubr.msk.f32.mxu0 %vm3190_vm1, %v3191_v41  ;;  %v1900_v0 = vrot.slane %v1886_v37, %v3461_v14  ;;  %v1901_v1 = vcombine.low %v3476_v30, %v3480_v10 }
 0x1ec   :  { %2959 = vmatmul.mubr.msk.f32.vlgmr.msra.gmra.mrb[12].mxu1 %vm996_vm2, %v88_v11  ;;  %v2237_v5 = vrot.slane %v2815_v58, %v3452_v48  ;;  %v2253_v40 = vrot.slane %v2817_v59, %v3452_v48  ;;  %v2819_v35 = vcombine.low %v2045_v52, %v2052_v56  ;;  %v2821_v39 = vcombine.high %v2045_v52, %v2052_v56 }
 0x1ed   :  { %v1233_v47 = vmul.f32 %v3410_v36, %v1219_v61  ;;  %v3515_v6 = vmul.f32 %v3412_v42, %v1219_v61  ;;  %v1220_v8 = vmul.f32 %v3065_v46, %v1212_v62  ;;  %2972 = vmatprep.mubr.msk.f32.mxu1 %vm3190_vm1, %v3191_v41  ;;  %v1902_v43 = vcombine.high %v3476_v30, %v3480_v10 }
 0x1ee   :  { %v2269_v3 = vrot.slane %v2819_v35, %v3452_v48  ;;  %v2285_v9 = vrot.slane %v2821_v39, %v3452_v48  ;;  %v2293_v13 = vcombine.low %v2237_v5, %v2253_v40  ;;  %v1909_v15 = vrot.slane %v1901_v1, %v3461_v14 }
 0x1ef   :  { %v2994_v63 = vpack.c.bf16 %v3515_v6, %v1233_v47  ;;  %v1853_v36 = vcombine.low %v3469_v60, %v1233_v47  ;;  %v1854_v42 = vcombine.high %v3469_v60, %v1233_v47  ;;  %v1989_v18 = vcombine.low %v3472_v27, %v3515_v6 }
 0x1f0   :  { %v1990_v41 = vcombine.high %v3472_v27, %v3515_v6  ;;  %v1235_v19 = vmul.f32 %v3418_v53, %v1220_v8  ;;  %v1236_v20 = vmul.f32 %v3420_v54, %v1220_v8  ;;  %v3534_v22 = vrot.slane %v2293_v13, %v3461_v14 }
 0x1f1   :  { %2995 = vmatpush3.bf16.msra.mxu0 %v2994_v63  ;;  %v2325_v24 = vcombine.low %v2269_v3, %v2285_v9  ;;  %v1916_v57 = vrot.slane %v1902_v43, %v3461_v14  ;;  %v2807_v49 = vcombine.low %v1893_v55, %v1900_v0  ;;  %v2809_v60 = vcombine.high %v1893_v55, %v1900_v0 }
 0x1f2   :  { %v2997_v28 = vpack.c.bf16 %v1236_v20, %v1235_v19  ;;  %v1869_v29 = vcombine.low %v3486_v4, %v1235_v19  ;;  %v1870_v30 = vcombine.high %v3486_v4, %v1235_v19  ;;  %v2005_v27 = vcombine.low %v3489_v32, %v1236_v20 }
 0x1f3   :  { %v2006_v53 = vcombine.high %v3489_v32, %v1236_v20  ;;  %v3542_v54 = vrot.slane %v2325_v24, %v3461_v14  ;;  %v2101_v16 = vrot.slane %v2807_v49, %v3452_v48  ;;  %v2117_v10 = vrot.slane %v2809_v60, %v3452_v48 }
 0x1f4   :  { %2998 = vmatpush3.bf16.msra.mxu1 %v2997_v28  ;;  %2966 = vmatmul.mubr.msk.f32.vlgmr.msra.gmra.mrb[14].mxu0 %vm996_vm2, %v89_v23  ;;  %v2811_v2 = vcombine.low %v1909_v15, %v1916_v57  ;;  %v2813_v33 = vcombine.high %v1909_v15, %v1916_v57  ;;  %v2294_v7 = vcombine.high %v2237_v5, %v2253_v40 }
 0x1f5   :  { %v2358_v4 = vcombine.high %v3534_v22, %v3542_v54  ;;  %v2157_v34 = vcombine.low %v2101_v16, %v2117_v10  ;;  %v2158_v31 = vcombine.high %v2101_v16, %v2117_v10  ;;  %v2326_v32 = vcombine.high %v2269_v3, %v2285_v9 }
 0x1f6   :  { %v2133_v37 = vrot.slane %v2811_v2, %v3452_v48  ;;  %v2149_v38 = vrot.slane %v2813_v33, %v3452_v48  ;;  %v2308_v45 = vrot.slane %v2294_v7, %v3461_v14  ;;  %v1861_v17 = vrot.slane %v1853_v36, %v3452_v48 }
 0x1f7   :  { %2973 = vmatmul.mubr.msk.f32.vlgmr.msra.gmra.mrb[14].mxu1 %vm996_vm2, %v90_v12  ;;  %2369 = vrot.lane.b32.xlu1 %v2358_v4, %s3194_s2  ;;  %v3556_v44 = vrot.slane %v2157_v34, %v3461_v14  ;;  %v2172_v46 = vrot.slane %v2158_v31, %v3461_v14  ;;  %v2340_v26 = vrot.slane %v2326_v32, %v3461_v14 }
 0x1f8   :  { %v2189_v21 = vcombine.low %v2133_v37, %v2149_v38  ;;  %v2190_v25 = vcombine.high %v2133_v37, %v2149_v38  ;;  %v1868_v11 = vrot.slane %v1854_v42, %v3452_v48  ;;  %v1877_v50 = vrot.slane %v1869_v29, %v3452_v48 }
 0x1f9   :  { %v2360_v51 = vcombine.high %v2308_v45, %v2340_v26  ;;  %v2359_v52 = vcombine.low %v2308_v45, %v2340_v26  ;;  %v1884_v55 = vrot.slane %v1870_v30, %v3452_v48  ;;  %v1997_v56 = vrot.slane %v1989_v18, %v3452_v48 }
 0x1fa   :  { %v3565_v58 = vrot.slane %v2189_v21, %v3461_v14  ;;  %v2204_v59 = vrot.slane %v2190_v25, %v3461_v14  ;;  %v1917_v61 = vcombine.low %v1861_v17, %v1877_v50  ;;  %v1918_v62 = vcombine.high %v1861_v17, %v1877_v50 }
 0x1fb   :  { %v1933_v0 = vcombine.low %v1868_v11, %v1884_v55  ;;  %v1934_v1 = vcombine.high %v1868_v11, %v1884_v55  ;;  %v2004_v5 = vrot.slane %v1990_v41, %v3452_v48  ;;  %v2013_v40 = vrot.slane %v2005_v27, %v3452_v48 }
 0x1fc   :  { %v2222_v35 = vcombine.high %v3556_v44, %v3565_v58  ;;  %v2223_v39 = vcombine.low %v2172_v46, %v2204_v59  ;;  %v2224_v47 = vcombine.high %v2172_v46, %v2204_v59  ;;  %v1925_v6 = vrot.slane %v1917_v61, %v3461_v14 }
 0x1fd   :  { %v1932_v8 = vrot.slane %v1918_v62, %v3461_v14  ;;  %v1941_v43 = vrot.slane %v1933_v0, %v3461_v14  ;;  %v1948_v3 = vrot.slane %v1934_v1, %v3461_v14  ;;  %v2020_v9 = vrot.slane %v2006_v53, %v3452_v48 }
 0x1fe   :  { %2367 = vrot.lane.b32.xlu0 %v2222_v35, %s3194_s2  ;;  %2375 = vrot.lane.b32.xlu1 %v2223_v39, %s3195_s25  ;;  %v2053_v13 = vcombine.low %v1997_v56, %v2013_v40  ;;  %v2054_v15 = vcombine.high %v1997_v56, %v2013_v40  ;;  %v2357_v63 = vcombine.low %v3534_v22, %v3542_v54 }
 0x1ff   :  { %v2808_v36 = vcombine.low %v1925_v6, %v1932_v8  ;;  %v2810_v42 = vcombine.high %v1925_v6, %v1932_v8  ;;  %v2812_v18 = vcombine.low %v1941_v43, %v1948_v3  ;;  %v2814_v41 = vcombine.high %v1941_v43, %v1948_v3 }
 0x200   :  { %v2061_v19 = vrot.slane %v2053_v13, %v3461_v14  ;;  %v2068_v20 = vrot.slane %v2054_v15, %v3461_v14  ;;  %v2069_v23 = vcombine.low %v2004_v5, %v2020_v9  ;;  %v2070_v24 = vcombine.high %v2004_v5, %v2020_v9 }
 0x201   :  { %v2108_v57 = vrot.slane %v2808_v36, %v3452_v48  ;;  %v2124_v49 = vrot.slane %v2810_v42, %v3452_v48  ;;  %v2140_v60 = vrot.slane %v2812_v18, %v3452_v48  ;;  %v2156_v28 = vrot.slane %v2814_v41, %v3452_v48 }
 0x202   :  { %2385 = vrot.lane.b32.xlu0 %v2360_v51, %s3196_s26  ;;  %2377 = vrot.lane.b32.xlu1 %v2359_v52, %s3195_s25  ;;  %v2077_v29 = vrot.slane %v2069_v23, %v3461_v14  ;;  %v2084_v30 = vrot.slane %v2070_v24, %v3461_v14  ;;  %v2816_v27 = vcombine.low %v2061_v19, %v2068_v20 }
 0x203   :  { %v2173_v53 = vcombine.low %v2108_v57, %v2124_v49  ;;  %v2205_v16 = vcombine.low %v2140_v60, %v2156_v28  ;;  %v2818_v10 = vcombine.high %v2061_v19, %v2068_v20  ;;  %v2174_v12 = vcombine.high %v2108_v57, %v2124_v49 }
 0x204   :  { %v2244_v2 = vrot.slane %v2816_v27, %v3452_v48  ;;  %v2820_v33 = vcombine.low %v2077_v29, %v2084_v30  ;;  %v2822_v7 = vcombine.high %v2077_v29, %v2084_v30  ;;  %v2206_v4 = vcombine.high %v2140_v60, %v2156_v28 }
 0x205   :  { %v2181_v34 = vrot.slane %v2173_v53, %v3461_v14  ;;  %v2213_v31 = vrot.slane %v2205_v16, %v3461_v14  ;;  %v2260_v32 = vrot.slane %v2818_v10, %v3452_v48  ;;  %v2188_v37 = vrot.slane %v2174_v12, %v3461_v14 }
 0x206   :  { %2383 = vrot.lane.b32.xlu1 %v2224_v47, %s3196_s26  ;;  %v2276_v38 = vrot.slane %v2820_v33, %v3452_v48  ;;  %v2292_v45 = vrot.slane %v2822_v7, %v3452_v48  ;;  %v2220_v17 = vrot.slane %v2206_v4, %v3461_v14  ;;  %v2221_v46 = vcombine.low %v3556_v44, %v3565_v58 }
 0x207   :  { %v2225_v26 = vcombine.low %v2181_v34, %v2213_v31  ;;  %v2309_v21 = vcombine.low %v2244_v2, %v2260_v32  ;;  %v2226_v25 = vcombine.high %v2181_v34, %v2213_v31  ;;  %v2310_v11 = vcombine.high %v2244_v2, %v2260_v32 }
 0x208   :  { %v2341_v50 = vcombine.low %v2276_v38, %v2292_v45  ;;  %v2227_v51 = vcombine.low %v2188_v37, %v2220_v17  ;;  %v2342_v52 = vcombine.high %v2276_v38, %v2292_v45  ;;  %v2228_v55 = vcombine.high %v2188_v37, %v2220_v17 }
 0x209   :  { %2391 = vrot.lane.b32.xlu0 %v2225_v26, %s3197_s29  ;;  %v2317_v56 = vrot.slane %v2309_v21, %v3461_v14  ;;  %v3605_v59 = vrot.slane %v2310_v11, %v3461_v14 }
 0x20a   :  { %v2349_v61 = vrot.slane %v2341_v50, %v3461_v14  ;;  %v3609_v44 = vrot.slane %v2342_v52, %v3461_v14 }
 0x20c   :  { %v2361_v58 = vcombine.low %v2317_v56, %v2349_v61  ;;  %v2362_v62 = vcombine.high %v2317_v56, %v2349_v61  ;;  %v2363_v0 = vcombine.low %v3605_v59, %v3609_v44  ;;  %v2364_v1 = vcombine.high %v3605_v59, %v3609_v44 }
 0x20e   :  { %2393 = vrot.lane.b32.xlu1 %v2361_v58, %s3197_s29  ;;  %2401 = vrot.lane.b32.xlu0 %v2362_v62, %s3198_s30 }
 0x212   :  { %2399 = vrot.lane.b32.xlu1 %v2226_v25, %s3198_s30  ;;  %2407 = vrot.lane.b32.xlu0 %v2227_v51, %s3199_s5 }
 0x216   :  { %2409 = vrot.lane.b32.xlu1 %v2363_v0, %s3199_s5 }
 0x21a   :  { %2415 = vrot.lane.b32.xlu1 %v2228_v55, %s3200_s6 }
 0x269   :  { %v2370_v5 = vpop.permute.xlu1 %2369 }
 0x26a   :  { %v2422_v40 = vsel %vm996_vm2, %v2357_v63, %v2370_v5 }
 0x270   :  { %v2368_v35 = vpop.permute.xlu0 %2367  ;;  %v2376_v39 = vpop.permute.xlu1 %2375 }
 0x271   :  { %v2421_v63 = vsel %vm996_vm2, %v2221_v46, %v2368_v35 }
 0x272   :  { %v2424_v36 = vsel %vm2423_vm4, %v2421_v63, %v2376_v39 }
 0x274   :  { %v2378_v47 = vpop.permute.xlu1 %2377  ;;  %v2386_v6 = vpop.permute.xlu0 %2385 }
 0x275   :  { %v2425_v8 = vsel %vm2423_vm4, %v2422_v40, %v2378_v47 }
 0x276   :  { %v2428_v43 = vsel %vm2426_vm3, %v2425_v8, %v2386_v6 }
 0x278   :  { %v2384_v3 = vpop.permute.xlu1 %2383 }
 0x279   :  { %v2427_v18 = vsel %vm2426_vm3, %v2424_v36, %v2384_v3 }
 0x27b   :  { %v2392_v9 = vpop.permute.xlu0 %2391 }
 0x27c   :  { %v2430_v41 = vsel %vm2429_vm6, %v2427_v18, %v2392_v9 }
 0x280   :  { %v2394_v13 = vpop.permute.xlu1 %2393  ;;  %v2402_v15 = vpop.permute.xlu0 %2401 }
 0x281   :  { %v2431_v22 = vsel %vm2429_vm6, %v2428_v43, %v2394_v13 }
 0x282   :  { %v2434_v54 = vsel %vm2432_vm5, %v2431_v22, %v2402_v15 }
 0x284   :  { %v2400_v42 = vpop.permute.xlu1 %2399  ;;  %v2408_v23 = vpop.permute.xlu0 %2407 }
 0x285   :  { %v2433_v20 = vsel %vm2432_vm5, %v2430_v41, %v2400_v42 }
 0x286   :  { %v2436_v57 = vsel %vm2435_vm7, %v2433_v20, %v2408_v23 }
 0x288   :  { %v2410_v19 = vpop.permute.xlu1 %2409 }
 0x289   :  { %v3635_v24 = vsel %vm2435_vm7, %v2434_v54, %v2410_v19 }
 0x28c   :  { %v2416_v49 = vpop.permute.xlu1 %2415 }
 0x28d   :  { %v2439_v60 = vsel %vm2438_vm8, %v2436_v57, %v2416_v49 }
 0x28e   :  { %2441 = vst [vmem:[#allocation9] sm:$0xff] %v2439_v60 }
 0x2ad   :  { %v1306_v28 = vpop.f32.mrb[8].mxu0 }
 0x2ae   :  { %v2925_v29 = vpop.f32.mrb[9].mxu0 }
 0x2b1   :  { %v1452_v30 = vpop.f32.mrb[10].mxu0 }
 0x2b2   :  { %v2443_v27 = vcombine.low %v1306_v28, %v1452_v30  ;;  %v2444_v53 = vcombine.high %v1306_v28, %v1452_v30  ;;  %v2939_v16 = vpop.f32.mrb[11].mxu0 }
 0x2b3   :  { %v1379_v10 = vpop.f32.mrb[8].mxu1 }
 0x2b4   :  { %v2932_v12 = vpop.f32.mrb[9].mxu1  ;;  %v2451_v33 = vrot.slane %v2443_v27, %v3452_v48  ;;  %v2458_v7 = vrot.slane %v2444_v53, %v3452_v48 }
 0x2ba   :  { %v1525_v2 = vpop.f32.mrb[10].mxu1 }
 0x2bb   :  { %v2459_v4 = vcombine.low %v1379_v10, %v1525_v2  ;;  %v2460_v34 = vcombine.high %v1379_v10, %v1525_v2  ;;  %v2946_v31 = vpop.f32.mrb[11].mxu1 }
 0x2bd   :  { %v2467_v32 = vrot.slane %v2459_v4, %v3452_v48  ;;  %v2474_v37 = vrot.slane %v2460_v34, %v3452_v48  ;;  %v1598_v38 = vpop.f32.mrb[12].mxu0 }
 0x2be   :  { %v2953_v45 = vpop.f32.mrb[13].mxu0 }
 0x2bf   :  { %v2507_v17 = vcombine.low %v2451_v33, %v2467_v32  ;;  %v2508_v46 = vcombine.high %v2451_v33, %v2467_v32  ;;  %v2523_v26 = vcombine.low %v2458_v7, %v2474_v37  ;;  %v2524_v21 = vcombine.high %v2458_v7, %v2474_v37  ;;  %v1671_v25 = vpop.f32.mrb[12].mxu1 }
 0x2c0   :  { %v2960_v11 = vpop.f32.mrb[13].mxu1 }
 0x2c1   :  { %v2515_v50 = vrot.slane %v2507_v17, %v3461_v14  ;;  %v2522_v51 = vrot.slane %v2508_v46, %v3461_v14  ;;  %v2531_v52 = vrot.slane %v2523_v26, %v3461_v14  ;;  %v2538_v55 = vrot.slane %v2524_v21, %v3461_v14 }
 0x2c3   :  { %v2823_v56 = vcombine.low %v2515_v50, %v2522_v51  ;;  %v2825_v61 = vcombine.high %v2515_v50, %v2522_v51  ;;  %v2827_v58 = vcombine.low %v2531_v52, %v2538_v55  ;;  %v2829_v62 = vcombine.high %v2531_v52, %v2538_v55 }
 0x2c5   :  { %v2587_v0 = vrot.slane %v2823_v56, %v3452_v48  ;;  %v2603_v5 = vrot.slane %v2825_v61, %v3452_v48  ;;  %v2619_v40 = vrot.slane %v2827_v58, %v3452_v48  ;;  %v2635_v35 = vrot.slane %v2829_v62, %v3452_v48 }
 0x2c7   :  { %v1744_v39 = vpop.f32.mrb[14].mxu0  ;;  %v2643_v47 = vcombine.low %v2587_v0, %v2603_v5  ;;  %v2675_v6 = vcombine.low %v2619_v40, %v2635_v35  ;;  %v2644_v8 = vcombine.high %v2587_v0, %v2603_v5  ;;  %v2676_v43 = vcombine.high %v2619_v40, %v2635_v35 }
 0x2c8   :  { %v2475_v3 = vcombine.low %v1598_v38, %v1744_v39  ;;  %v2476_v9 = vcombine.high %v1598_v38, %v1744_v39  ;;  %v2967_v13 = vpop.f32.mrb[15].mxu0 }
 0x2c9   :  { %v2651_v15 = vrot.slane %v2643_v47, %v3461_v14  ;;  %v2683_v22 = vrot.slane %v2675_v6, %v3461_v14  ;;  %v2658_v54 = vrot.slane %v2644_v8, %v3461_v14  ;;  %v2690_v63 = vrot.slane %v2676_v43, %v3461_v14 }
 0x2ca   :  { %v2483_v36 = vrot.slane %v2475_v3, %v3452_v48  ;;  %v2490_v42 = vrot.slane %v2476_v9, %v3452_v48  ;;  %v1817_v18 = vpop.f32.mrb[14].mxu1 }
 0x2cb   :  { %v2491_v41 = vcombine.low %v1671_v25, %v1817_v18  ;;  %v2492_v19 = vcombine.high %v1671_v25, %v1817_v18  ;;  %v2974_v20 = vpop.f32.mrb[15].mxu1  ;;  %v2708_v23 = vcombine.high %v2651_v15, %v2683_v22  ;;  %v2709_v57 = vcombine.low %v2658_v54, %v2690_v63 }
 0x2cc   :  { %v2710_v49 = vcombine.high %v2658_v54, %v2690_v63  ;;  %v2707_v60 = vcombine.low %v2651_v15, %v2683_v22 }
 0x2cd   :  { %v2499_v28 = vrot.slane %v2491_v41, %v3452_v48  ;;  %v2506_v29 = vrot.slane %v2492_v19, %v3452_v48  ;;  %2716 = vrot.lane.b32.xlu1 %v2708_v23, %s3194_s2  ;;  %2720 = vrot.lane.b32.xlu0 %v2709_v57, %s3195_s25 }
 0x2cf   :  { %v2539_v30 = vcombine.low %v2483_v36, %v2499_v28  ;;  %v2540_v27 = vcombine.high %v2483_v36, %v2499_v28  ;;  %v2555_v53 = vcombine.low %v2490_v42, %v2506_v29  ;;  %v2556_v16 = vcombine.high %v2490_v42, %v2506_v29 }
 0x2d1   :  { %v2547_v10 = vrot.slane %v2539_v30, %v3461_v14  ;;  %v2554_v12 = vrot.slane %v2540_v27, %v3461_v14  ;;  %v2563_v2 = vrot.slane %v2555_v53, %v3461_v14  ;;  %v2570_v33 = vrot.slane %v2556_v16, %v3461_v14  ;;  %2724 = vrot.lane.b32.xlu1 %v2710_v49, %s3196_s26 }
 0x2d3   :  { %v2824_v7 = vcombine.low %v2547_v10, %v2554_v12  ;;  %v2826_v4 = vcombine.high %v2547_v10, %v2554_v12  ;;  %v2828_v34 = vcombine.low %v2563_v2, %v2570_v33  ;;  %v2830_v31 = vcombine.high %v2563_v2, %v2570_v33 }
 0x2d5   :  { %v2594_v32 = vrot.slane %v2824_v7, %v3452_v48  ;;  %v2610_v37 = vrot.slane %v2826_v4, %v3452_v48  ;;  %v2626_v38 = vrot.slane %v2828_v34, %v3452_v48  ;;  %v2642_v45 = vrot.slane %v2830_v31, %v3452_v48 }
 0x2d7   :  { %v2659_v17 = vcombine.low %v2594_v32, %v2610_v37  ;;  %v2691_v46 = vcombine.low %v2626_v38, %v2642_v45  ;;  %v2660_v26 = vcombine.high %v2594_v32, %v2610_v37  ;;  %v2692_v21 = vcombine.high %v2626_v38, %v2642_v45 }
 0x2d9   :  { %v2667_v25 = vrot.slane %v2659_v17, %v3461_v14  ;;  %v2699_v11 = vrot.slane %v2691_v46, %v3461_v14  ;;  %v2674_v50 = vrot.slane %v2660_v26, %v3461_v14  ;;  %v2706_v51 = vrot.slane %v2692_v21, %v3461_v14 }
 0x2db   :  { %v2712_v52 = vcombine.high %v2667_v25, %v2699_v11  ;;  %v2711_v55 = vcombine.low %v2667_v25, %v2699_v11  ;;  %v2714_v56 = vcombine.high %v2674_v50, %v2706_v51  ;;  %v2713_v61 = vcombine.low %v2674_v50, %v2706_v51 }
 0x2dd   :  { %2732 = vrot.lane.b32.xlu1 %v2712_v52, %s3198_s30  ;;  %2728 = vrot.lane.b32.xlu0 %v2711_v55, %s3197_s29 }
 0x2e1   :  { %2740 = vrot.lane.b32.xlu1 %v2714_v56, %s3200_s6  ;;  %2736 = vrot.lane.b32.xlu0 %v2713_v61, %s3199_s5 }
 0x2e5   :  { %2417 = vrot.lane.b32.xlu0 %v2364_v1, %s3200_s6 }
 0x33f   :  { %v2717_v48 = vpop.permute.xlu1 %2716  ;;  %v2721_v58 = vpop.permute.xlu0 %2720 }
 0x340   :  { %v2743_v14 = vsel %vm996_vm2, %v2707_v60, %v2717_v48 }
 0x341   :  { %v2744_v0 = vsel %vm2423_vm4, %v2743_v14, %v2721_v58 }
 0x343   :  { %v2725_v62 = vpop.permute.xlu1 %2724 }
 0x344   :  { %v2745_v5 = vsel %vm2426_vm3, %v2744_v0, %v2725_v62 }
 0x34f   :  { %v2733_v40 = vpop.permute.xlu1 %2732  ;;  %v2729_v35 = vpop.permute.xlu0 %2728 }
 0x350   :  { %v2746_v39 = vsel %vm2429_vm6, %v2745_v5, %v2729_v35 }
 0x351   :  { %v2747_v6 = vsel %vm2432_vm5, %v2746_v39, %v2733_v40 }
 0x353   :  { %v2741_v47 = vpop.permute.xlu1 %2740  ;;  %v2737_v59 = vpop.permute.xlu0 %2736 }
 0x354   :  { %v2748_v44 = vsel %vm2435_vm7, %v2747_v6, %v2737_v59 }
 0x355   :  { %v2749_v1 = vsel %vm2438_vm8, %v2748_v44, %v2741_v47 }
 0x356   :  { %2750 = vst [vmem:[#allocation8] sm:$0xff] %v2749_v1 }
 0x357   :  { %v2418_v8 = vpop.permute.xlu0 %2417 }
 0x358   :  { %3143 = shalt.err (!%p3140_p0)
}
 0x359   :  { %s3144_s13 = scalar_lea.hbm %s3728_s3, 128 }
 0x35a   :  { %p3145_p1 = scmp.ne.s32.totalorder %s3728_s3, %s3144_s13  ;;  %p3148_p2 = scmp.lt.u32.totalorder %s3144_s13, %s3728_s3 }
 0x35c   :  { %p3150_p3 = pnand %p3148_p2, %p3145_p1 }
 0x35e   :  { %3153 = shalt.err (!%p3150_p3)
}
 0x35f   :  { %2760 = dma.vmem_to_hbm [thread:$0]  %s2758_s8, 128, %s3728_s3, [#allocation4]   ;;  %v2440_v43 = vsel %vm2438_vm8, %v3635_v24, %v2418_v8 }
 0x360   :  { %2442 = vst [vmem:[#allocation9 + $0x8] sm:$0xff] %v2440_v43  ;;  %s3154_s21 = scalar_lea.vmem %s3689_s10, 256  ;;  %p3159_p5 = scmp.lt.s32.totalorder %s3689_s10, %s3689_s10 }
 0x361   :  { %p3155_p4 = scmp.ne.s32.totalorder %s3689_s10, %s3154_s21  ;;  %p3160_p6 = scmp.lt.s32.totalorder %s3154_s21, %s3154_s21 }
 0x363   :  { %p3161_p7 = por %p3160_p6, %p3159_p5 }
 0x365   :  { %p3162_p8 = pnand %p3161_p7, %p3155_p4 }
 0x367   :  { %3165 = shalt.err (!%p3162_p8)
}
 0x368   :  { %s3166_s24 = scalar_lea.hbm %s3729_s4, 256 }
 0x369   :  { %p3167_p9 = scmp.ne.s32.totalorder %s3729_s4, %s3166_s24  ;;  %p3170_p10 = scmp.lt.u32.totalorder %s3166_s24, %s3729_s4 }
 0x36b   :  { %p3172_p11 = pnand %p3170_p10, %p3167_p9 }
 0x36d   :  { %3175 = shalt.err (!%p3172_p11)
}
 0x36e   :  { %2772 = dma.vmem_to_hbm [thread:$0]  %s3689_s10, 256, %s3729_s4, [#allocation10], %s3186_s27, %s3186_s27, %s3187_s28  }
 0x36f   :  { %3180 = dma.done.wait [#allocation4], 128  }
 0x370   :  { %3181 = vsyncadd [#allocation4], 4294967168 }
 0x371   :  { %3182 = dma.done.wait [#allocation10], 256  }
 0x372   :  { %3183 = vsyncadd [#allocation10], 4294967040 }
 0x373   :  { %2779 = vsyncpa [#allocation3], 1 }
 0x374   :  { %2780 = vsyncpa [#allocation6], 1 }
 0x375   :  { %2781 = vsyncpa [#allocation4], 1 }
 0x376   :  { %2782 = vsyncpa [#allocation10], 1 }

</bundles_post_ra>
